<compile_context>
chip_gen: v7x
topology: tpu7x:2x2x1
jax: 0.10.0
libtpu: 0.0.40
codegen_flags: <defaults>
</compile_context>

<pallas_src>
import functools
import math

import jax
import jax.numpy as jnp
from jax.experimental import pallas as pl
from jax.experimental.pallas import tpu as pltpu


# ----------------------------------------------------------------------------
# Helpers
# ----------------------------------------------------------------------------
def _pick_tile_h(H, W, target_rows=1024):
    """Largest divisor of H with tile_h * W <= target_rows (at least 1)."""
    best = 1
    for t in range(1, H + 1):
        if H % t == 0 and t * W <= target_rows:
            best = t
    return best


def _leaky_relu(v):
    return jnp.where(v > 0, v, 0.2 * v)


def _vmem_limit(est_bytes):
    # >= the per-generation defaults, <= what is safe on v7x (64 MiB physical).
    return int(min(max(2 * est_bytes, 32 * 1024 * 1024), 56 * 1024 * 1024))


def _conv_chunk(xflat, w_ref, col, row0, m, cin, W, wb=None):
    """One (m, cout) chunk of a 3x3 / stride-1 / pad-1 conv.

    Per-dy im2col (3 dx-shifted bf16 slabs concatenated on lanes) followed by a
    bf16 MXU matmul with f32 accumulation; 3 matmuls total (K = 3*cin each).

    xflat : bf16 VMEM staging ref; padded flat rows, channel-concatenated.
    w_ref : bf16 weights; last two dims (3*cin, cout). `wb` = leading index.
    row0  : first xflat row of this output chunk (static python int).
    col   : (m, 1) int32 column index of each output row (for edge masking).
    """
    acc = None
    for dy in range(3):
        slabs = []
        for dx in range(3):
            start = row0 + (dy - 1) * W + (dx - 1)
            slab = xflat[start:start + m, 0:cin]
            if dx == 0:                      # left neighbour invalid at col 0
                slab = jnp.where(col > 0, slab, jnp.zeros_like(slab))
            elif dx == 2:                    # right neighbour invalid at col W-1
                slab = jnp.where(col < W - 1, slab, jnp.zeros_like(slab))
            slabs.append(slab)
        patch = jnp.concatenate(slabs, axis=-1)               # (m, 3*cin) bf16
        wslab = w_ref[dy] if wb is None else w_ref[wb, dy]    # (3*cin, cout)
        part = jnp.dot(patch, wslab, preferred_element_type=jnp.float32)
        acc = part if acc is None else acc + part
    return acc                                                 # (m, cout) f32


# ----------------------------------------------------------------------------
# Single fused conv kernel (conv_first / conv_body+skip / conv_up+LeakyReLU)
# ----------------------------------------------------------------------------
@functools.lru_cache(maxsize=None)
def _make_conv_kernel(H, W, cin, cout, tile_h, relu, has_res):
    HW = H * W
    m = tile_h * W
    n_chunks = H // tile_h
    top = 2 * W                         # first interior row of xflat

    def kernel(*refs):
        x_ref, w_ref, b_ref = refs[0], refs[1], refs[2]
        nxt = 3
        res_ref = None
        if has_res:
            res_ref = refs[nxt]
            nxt += 1
        o_ref, xflat = refs[nxt], refs[nxt + 1]

        # Stage: zero only the guard bands, copy the image into the interior.
        zeros_band = jnp.zeros((2 * W, cin), xflat.dtype)
        xflat[0:2 * W, :] = zeros_band
        xflat[top + HW: top + HW + 2 * W, :] = zeros_band
        xflat[top: top + HW, :] = x_ref[0]

        col = jax.lax.broadcasted_iota(jnp.int32, (m, 1), 0) % W
        for c in range(n_chunks):
            p0 = c * m
            acc = _conv_chunk(xflat, w_ref, col, top + p0, m, cin, W)
            out = acc + b_ref[...]                        # f32 epilogue
            if relu:
                out = _leaky_relu(out)
            if has_res:
                out = out + res_ref[0, p0:p0 + m, :].astype(jnp.float32)
            o_ref[0, p0:p0 + m, :] = out.astype(o_ref.dtype)

    return kernel


def conv3x3(x, w_k, b_k, *, relu=False, residual=None):
    """Fused 3x3/stride-1/pad-1 conv + bias (+LeakyReLU(0.2)) (+unit residual).

    x        : (N, H, W, Cin) activations (cast to bf16 for HBM/MXU).
    w_k      : (3, 3*Cin, Cout) bf16 weights (HWIO reshaped, grouped per dy).
    b_k      : (1, Cout) f32 bias.
    residual : optional (N, H, W, Cout) added in the f32 epilogue.
    """
    N, H, W, cin = x.shape
    cout = int(w_k.shape[-1])
    assert w_k.shape == (3, 3 * cin, cout)
    tile_h = _pick_tile_h(H, W)
    m = tile_h * W
    kernel = _make_conv_kernel(H, W, cin, cout, tile_h, bool(relu),
                               residual is not None)

    x_flat = x.reshape(N, H * W, cin).astype(jnp.bfloat16)
    args = [x_flat, w_k.astype(jnp.bfloat16), b_k.astype(jnp.float32)]
    in_specs = [
        pl.BlockSpec((1, H * W, cin), lambda n: (n, 0, 0)),
        pl.BlockSpec((3, 3 * cin, cout), lambda n: (0, 0, 0)),
        pl.BlockSpec((1, cout), lambda n: (0, 0)),
    ]
    if residual is not None:
        args.append(residual.reshape(N, H * W, cout).astype(jnp.bfloat16))
        in_specs.append(pl.BlockSpec((1, H * W, cout), lambda n: (n, 0, 0)))

    act_in = H * W * cin * 2
    act_out = H * W * cout * 2
    w_bytes = 9 * cin * cout * 2
    res_bytes = act_out if residual is not None else 0
    est = (2 * (act_in + act_out + res_bytes) + 2 * w_bytes
           + (H + 4) * W * cin * 2 + 3 * m * (3 * cin * 2 + cout * 4))
    cost = pl.CostEstimate(
        flops=2 * N * H * W * 9 * cin * cout,
        transcendentals=0,
        bytes_accessed=N * (act_in + act_out + res_bytes) + w_bytes + cout * 4)

    out_flat = pl.pallas_call(
        kernel,
        out_shape=jax.ShapeDtypeStruct((N, H * W, cout), jnp.bfloat16),
        grid=(N,),
        in_specs=in_specs,
        out_specs=pl.BlockSpec((1, H * W, cout), lambda n: (n, 0, 0)),
        scratch_shapes=[pltpu.VMEM(((H + 4) * W, cin), jnp.bfloat16)],
        compiler_params=pltpu.CompilerParams(
            dimension_semantics=("parallel",),
            vmem_limit_bytes=_vmem_limit(est)),
        cost_estimate=cost,
    )(*args)
    return out_flat.reshape(N, H, W, cout)


# ----------------------------------------------------------------------------
# Fused RRDB kernel: 3 dense blocks x 5 convs in a single pallas_call
# ----------------------------------------------------------------------------
@functools.lru_cache(maxsize=None)
def _make_rrdb_kernel(H, W, mid, growth, tile_h):
    HW = H * W
    m = tile_h * W
    n_chunks = H // tile_h
    top = 2 * W
    cins = [mid + i * growth for i in range(5)]
    couts = [growth] * 4 + [mid]
    ctot = mid + 4 * growth

    def kernel(*refs):
        x_ref = refs[0]
        w_refs = [refs[1 + 2 * i] for i in range(5)]
        b_refs = [refs[2 + 2 * i] for i in range(5)]
        o_ref, xflat, curbuf = refs[11], refs[12], refs[13]

        # Zero only the guard bands once per image; stage x into channels [0:mid].
        zeros_band = jnp.zeros((2 * W, ctot), xflat.dtype)
        xflat[0:2 * W, :] = zeros_band
        xflat[top + HW: top + HW + 2 * W, :] = zeros_band
        xflat[top: top + HW, 0:mid] = x_ref[0]

        col = jax.lax.broadcasted_iota(jnp.int32, (m, 1), 0) % W

        for r in range(3):                       # 3 dense blocks of one RRDB
            for i in range(5):                   # 5 convs of one dense block
                cin, cout = cins[i], couts[i]
                for c in range(n_chunks):
                    p0 = c * m
                    acc = _conv_chunk(xflat, w_refs[i], col, top + p0, m, cin,
                                      W, wb=r)
                    out = acc + b_refs[i][r]                      # f32
                    if i < 4:
                        # LeakyReLU'd growth features go straight into their
                        # channel slab of the staging buffer (never to HBM).
                        out = _leaky_relu(out)
                        xflat[top + p0: top + p0 + m,
                              mid + i * growth: mid + (i + 1) * growth] = (
                                  out.astype(xflat.dtype))
                    else:
                        cur = xflat[top + p0: top + p0 + m, 0:mid].astype(
                            jnp.float32)
                        new_cur = out * 0.2 + cur                 # dense-block skip
                        if r < 2:
                            # Buffer so later chunks still see the old `cur`
                            # rows in their im2col halo.
                            curbuf[p0:p0 + m, :] = new_cur.astype(curbuf.dtype)
                        else:
                            xin = x_ref[0, p0:p0 + m, :].astype(jnp.float32)
                            o_ref[0, p0:p0 + m, :] = (
                                new_cur * 0.2 + xin).astype(o_ref.dtype)  # RRDB skip
            if r < 2:
                # Dense-block output becomes the next block's input slab.
                xflat[top: top + HW, 0:mid] = curbuf[...]

    return kernel


def rrdb_block(x, wp):
    """One fused RRDB: out = rdb3(rdb2(rdb1(x))) * 0.2 + x, single pallas_call."""
    N, H, W, mid = x.shape
    growth = int(wp["w"][0].shape[-1])
    cins = [mid + i * growth for i in range(5)]
    couts = [growth] * 4 + [mid]
    ctot = mid + 4 * growth
    tile_h = _pick_tile_h(H, W)
    m = tile_h * W
    kernel = _make_rrdb_kernel(H, W, mid, growth, tile_h)

    x_flat = x.reshape(N, H * W, mid).astype(jnp.bfloat16)
    args = [x_flat]
    in_specs = [pl.BlockSpec((1, H * W, mid), lambda n: (n, 0, 0))]
    for i in range(5):
        wi, bi = wp["w"][i], wp["b"][i]
        assert wi.shape == (3, 3, 3 * cins[i], couts[i])
        args += [wi, bi]
        in_specs += [pl.BlockSpec(wi.shape, lambda n: (0, 0, 0, 0)),
                     pl.BlockSpec(bi.shape, lambda n: (0, 0, 0))]

    w_bytes = sum(3 * 9 * cins[i] * couts[i] * 2 for i in range(5))
    act = H * W * mid * 2
    est = (5 * act + 2 * w_bytes + (H + 4) * W * ctot * 2
           + 3 * m * (3 * ctot * 2 + mid * 4))
    cost = pl.CostEstimate(
        flops=2 * N * H * W * 3 * sum(9 * cins[i] * couts[i] for i in range(5)),
        transcendentals=0,
        bytes_accessed=N * 2 * act + w_bytes)

    out_flat = pl.pallas_call(
        kernel,
        out_shape=jax.ShapeDtypeStruct((N, H * W, mid), jnp.bfloat16),
        grid=(N,),
        in_specs=in_specs,
        out_specs=pl.BlockSpec((1, H * W, mid), lambda n: (n, 0, 0)),
        scratch_shapes=[pltpu.VMEM(((H + 4) * W, ctot), jnp.bfloat16),
                        pltpu.VMEM((H * W, mid), jnp.bfloat16)],
        compiler_params=pltpu.CompilerParams(
            dimension_semantics=("parallel",),
            vmem_limit_bytes=_vmem_limit(est)),
        cost_estimate=cost,
    )(*args)
    return out_flat.reshape(N, H, W, mid)


# ----------------------------------------------------------------------------
# Parameter construction (deterministic, synthetic), stored kernel-ready:
#   single convs : w (3, 3*Cin, Cout) bf16, b (1, Cout) f32
#   RRDB convs   : w (3 rdb, 3 dy, 3*Cin, Cout) bf16, b (3 rdb, 1, Cout) f32
# ----------------------------------------------------------------------------
def _init_conv_raw(key, cin, cout):
    kw, kb = jax.random.split(key)
    w = jax.random.normal(kw, (3, 3, cin, cout), jnp.float32) * (
        0.1 / math.sqrt(9 * cin))
    b = jax.random.normal(kb, (cout,), jnp.float32) * 0.01
    return w, b


def _init_single(key, cin, cout):
    w, b = _init_conv_raw(key, cin, cout)
    return (w.reshape(3, 3 * cin, cout).astype(jnp.bfloat16),
            b.reshape(1, cout).astype(jnp.float32))


def _init_rrdb(key, mid, growth):
    keys = jax.random.split(key, 15)
    raw, k = [], 0
    for _ in range(3):
        convs = []
        for i in range(5):
            cin = mid + i * growth
            cout = mid if i == 4 else growth
            convs.append(_init_conv_raw(keys[k], cin, cout))
            k += 1
        raw.append(convs)
    wp = {"w": [], "b": []}
    for i in range(5):
        cin = mid + i * growth
        cout = mid if i == 4 else growth
        wp["w"].append(jnp.stack(
            [raw[r][i][0].reshape(3, 3 * cin, cout) for r in range(3)]
        ).astype(jnp.bfloat16))
        wp["b"].append(jnp.stack(
            [raw[r][i][1].reshape(1, cout) for r in range(3)]
        ).astype(jnp.float32))
    return wp


def init_rrdbnet(key, num_in=3, num_mid=64, num_out=256, num_blocks=23,
                 num_grow=32):
    keys = jax.random.split(key, num_blocks + 3)
    return {
        "conv_first": _init_single(keys[0], num_in, num_mid),
        "body": [_init_rrdb(keys[1 + i], num_mid, num_grow)
                 for i in range(num_blocks)],
        "conv_body": _init_single(keys[num_blocks + 1], num_mid, num_mid),
        "conv_up": _init_single(keys[num_blocks + 2], num_mid, num_out),
    }


# ----------------------------------------------------------------------------
# Forward pass (mirrors the PyTorch module; NHWC; skips fused into epilogues)
# ----------------------------------------------------------------------------
def rrdbnet_forward(x, params):
    x = x.astype(jnp.bfloat16)
    feat = conv3x3(x, *params["conv_first"])
    body = feat
    for wp in params["body"]:
        body = rrdb_block(body, wp)
    feat = conv3x3(body, *params["conv_body"], residual=feat)   # + feat skip, fused
    out = conv3x3(feat, *params["conv_up"], relu=True)          # + LeakyReLU, fused
    return out.astype(jnp.float32)


# ----------------------------------------------------------------------------
# Pure-JAX (XLA) reference with the same bf16 rounding points, for validation
# ----------------------------------------------------------------------------
def _ref_conv(x, w_k, b_k):
    cout = int(w_k.shape[-1])
    cin = int(w_k.shape[-2]) // 3
    w = w_k.reshape(3, 3, cin, cout).astype(jnp.bfloat16)
    y = jax.lax.conv_general_dilated(
        x.astype(jnp.bfloat16), w, (1, 1), "SAME",
        dimension_numbers=("NHWC", "HWIO", "NHWC"),
        preferred_element_type=jnp.float32)
    return y + b_k.reshape(-1).astype(jnp.float32)


def _ref_rdb(x, wp, r):
    feats = [x]
    for i in range(4):
        cat = feats[0] if i == 0 else jnp.concatenate(feats, axis=-1)
        feats.append(_leaky_relu(_ref_conv(cat, wp["w"][i][r], wp["b"][i][r]))
                     .astype(jnp.bfloat16))
    x5 = _ref_conv(jnp.concatenate(feats, axis=-1), wp["w"][4][r], wp["b"][4][r])
    return x5 * 0.2 + x.astype(jnp.float32)


def _ref_rrdb(x, wp):
    cur = x
    out = None
    for r in range(3):
        out = _ref_rdb(cur, wp, r)
        if r < 2:
            cur = out.astype(jnp.bfloat16)
    return (out * 0.2 + x.astype(jnp.float32)).astype(jnp.bfloat16)


def _ref_net(x, params):
    x = x.astype(jnp.bfloat16)
    feat = _ref_conv(x, *params["conv_first"]).astype(jnp.bfloat16)
    body = feat
    for wp in params["body"]:
        body = _ref_rrdb(body, wp)
    feat = (_ref_conv(body, *params["conv_body"])
            + feat.astype(jnp.float32)).astype(jnp.bfloat16)
    out = _leaky_relu(_ref_conv(feat, *params["conv_up"]))
    return out.astype(jnp.bfloat16).astype(jnp.float32)


# ----------------------------------------------------------------------------
# Main
# ----------------------------------------------------------------------------
if __name__ == "__main__":
    key = jax.random.PRNGKey(0)
    kx, kp, kf = jax.random.split(key, 3)

    # Small config consistent with the module (default mid/growth widths,
    # tiny spatial extent and block count).
    N, H, W = 2, 8, 8
    num_in, num_mid, num_out, num_blocks, num_grow = 3, 64, 128, 2, 32

    x = jax.random.normal(kx, (N, H, W, num_in), jnp.float32)   # NHWC input
    params = init_rrdbnet(kp, num_in, num_mid, num_out, num_blocks, num_grow)

    # Check 1: fused single-conv Pallas kernel vs XLA conv reference.
    w0, b0 = params["conv_first"]
    got = jax.jit(lambda v: conv3x3(v, w0, b0))(x)
    ref = _ref_conv(x, w0, b0)
    assert jnp.allclose(got.astype(jnp.float32), ref, atol=1e-2, rtol=1e-2), \
        "conv3x3 mismatch vs XLA reference"

    # Check 2: fused whole-RRDB kernel vs XLA reference (same rounding points).
    feat = (0.1 * jax.random.normal(kf, (N, H, W, num_mid), jnp.float32)
            ).astype(jnp.bfloat16)
    got_r = jax.jit(lambda v: rrdb_block(v, params["body"][0]))(feat).astype(
        jnp.float32)
    ref_r = _ref_rrdb(feat, params["body"][0]).astype(jnp.float32)
    rel = jnp.linalg.norm(got_r - ref_r) / jnp.linalg.norm(ref_r)
    assert float(rel) < 3e-2, f"RRDB mismatch: rel L2 = {float(rel)}"

    # Full forward pass.
    fwd = jax.jit(rrdbnet_forward)
    out = fwd(x, params)
    jax.block_until_ready(out)
    assert out.shape == (N, H, W, num_out)
    assert bool(jnp.all(jnp.isfinite(out)))
    ref_out = _ref_net(x, params)
    rel = jnp.linalg.norm(out - ref_out) / jnp.linalg.norm(ref_out)
    assert float(rel) < 3e-2, f"RRDBNet mismatch: rel L2 = {float(rel)}"
    print("KERNEL_OK")
</pallas_src>

<mosaic_0001>
module attributes {stable_mosaic.version = 11 : i64} {
  func.func @kernel(%arg0: i32, %arg1: memref<1x64x3xbf16, #tpu.memory_space<vmem>>, %arg2: memref<3x9x64xbf16, #tpu.memory_space<vmem>>, %arg3: memref<1x64xf32, #tpu.memory_space<vmem>>, %arg4: memref<1x64x64xbf16, #tpu.memory_space<vmem>>, %arg5: memref<96x3xbf16, #tpu.memory_space<vmem>>) attributes {dimension_semantics = [#tpu.dimension_semantics<parallel>], iteration_bounds = array<i64: 2>, scalar_prefetch = 0 : i64, scratch_operands = 1 : i64, tpu.core_type = #tpu.core_type<tc>, window_params = [{transform_indices = @transform_0, window_bounds = array<i64: 1, 64, 3>}, {pipeline_mode = #tpu.pipeline_mode<synchronous>, transform_indices = @transform_1, window_bounds = array<i64: 3, 9, 64>}, {pipeline_mode = #tpu.pipeline_mode<synchronous>, transform_indices = @transform_2, window_bounds = array<i64: 1, 64>}, {transform_indices = @transform_3, window_bounds = array<i64: 1, 64, 64>}]} {
    %cst = arith.constant 0.000000e+00 : bf16
    %0 = vector.broadcast %cst : bf16 to vector<16x3xbf16>
    %c0 = arith.constant 0 : index
    %c0_0 = arith.constant 0 : index
    %1 = vector.load %arg5[%c0, %c0_0] : memref<96x3xbf16, #tpu.memory_space<vmem>>, vector<16x3xbf16>
    tpu.vector_store %arg5[%c0, %c0_0], %0 {strides = array<i32>} : memref<96x3xbf16, #tpu.memory_space<vmem>>, vector<16x3xbf16>,
    %c80 = arith.constant 80 : index
    %c0_1 = arith.constant 0 : index
    %2 = vector.load %arg5[%c80, %c0_1] : memref<96x3xbf16, #tpu.memory_space<vmem>>, vector<16x3xbf16>
    tpu.vector_store %arg5[%c80, %c0_1], %0 {strides = array<i32>} : memref<96x3xbf16, #tpu.memory_space<vmem>>, vector<16x3xbf16>,
    %c0_2 = arith.constant 0 : index
    %c0_3 = arith.constant 0 : index
    %c0_4 = arith.constant 0 : index
    %3 = vector.load %arg1[%c0_2, %c0_3, %c0_4] : memref<1x64x3xbf16, #tpu.memory_space<vmem>>, vector<1x64x3xbf16>
    %4 = vector.shape_cast %3 : vector<1x64x3xbf16> to vector<64x3xbf16>
    %c16 = arith.constant 16 : index
    %c0_5 = arith.constant 0 : index
    %5 = vector.load %arg5[%c16, %c0_5] : memref<96x3xbf16, #tpu.memory_space<vmem>>, vector<64x3xbf16>
    tpu.vector_store %arg5[%c16, %c0_5], %4 {strides = array<i32>} : memref<96x3xbf16, #tpu.memory_space<vmem>>, vector<64x3xbf16>,
    %6 = tpu.iota {dimensions = array<i32: 0>} : vector<64x1xi32>
    %c8_i32 = arith.constant 8 : i32
    %c0_i32 = arith.constant 0 : i32
    %7 = arith.cmpi eq, %c8_i32, %c0_i32 : i32
    %c1_i32 = arith.constant 1 : i32
    %8 = arith.select %7, %c1_i32, %c8_i32 : i32
    %9 = vector.broadcast %8 : i32 to vector<64x1xi32>
    %10 = arith.remsi %6, %9 : vector<64x1xi32>
    %c0_i32_6 = arith.constant 0 : i32
    %11 = vector.broadcast %c0_i32_6 : i32 to vector<64x1xi32>
    %12 = arith.cmpi ne, %10, %11 : vector<64x1xi32>
    %c0_i32_7 = arith.constant 0 : i32
    %13 = vector.broadcast %c0_i32_7 : i32 to vector<64x1xi32>
    %14 = arith.cmpi slt, %10, %13 : vector<64x1xi32>
    %c0_i32_8 = arith.constant 0 : i32
    %15 = arith.cmpi slt, %8, %c0_i32_8 : i32
    %16 = vector.broadcast %15 : i1 to vector<64x1xi1>
    %17 = vector.broadcast %16 : vector<64x1xi1> to vector<64x1xi1>
    %18 = arith.xori %14, %17 : vector<64x1xi1>
    %19 = arith.andi %18, %12 : vector<64x1xi1>
    %20 = vector.broadcast %8 : i32 to vector<64x1xi32>
    %21 = arith.addi %10, %20 : vector<64x1xi32>
    %22 = arith.select %19, %21, %10 : vector<64x1xi1>, vector<64x1xi32>
    %c7 = arith.constant 7 : index
    %c0_9 = arith.constant 0 : index
    %23 = vector.load %arg5[%c7, %c0_9] : memref<96x3xbf16, #tpu.memory_space<vmem>>, vector<64x3xbf16>
    %c0_i32_10 = arith.constant 0 : i32
    %24 = vector.broadcast %c0_i32_10 : i32 to vector<64x1xi32>
    %25 = arith.cmpi sgt, %22, %24 : vector<64x1xi32>
    %cst_11 = arith.constant 0.000000e+00 : bf16
    %26 = vector.broadcast %cst_11 : bf16 to vector<64x3xbf16>
    %27 = vector.shape_cast %25 : vector<64x1xi1> to vector<64x1xi1>
    %28 = vector.broadcast %27 : vector<64x1xi1> to vector<64x3xi1>
    %29 = arith.select %28, %23, %26 : vector<64x3xi1>, vector<64x3xbf16>
    %c8 = arith.constant 8 : index
    %c0_12 = arith.constant 0 : index
    %30 = vector.load %arg5[%c8, %c0_12] : memref<96x3xbf16, #tpu.memory_space<vmem>>, vector<64x3xbf16>
    %c9 = arith.constant 9 : index
    %c0_13 = arith.constant 0 : index
    %31 = vector.load %arg5[%c9, %c0_13] : memref<96x3xbf16, #tpu.memory_space<vmem>>, vector<64x3xbf16>
    %c7_i32 = arith.constant 7 : i32
    %32 = vector.broadcast %c7_i32 : i32 to vector<64x1xi32>
    %33 = arith.cmpi slt, %22, %32 : vector<64x1xi32>
    %cst_14 = arith.constant 0.000000e+00 : bf16
    %34 = vector.broadcast %cst_14 : bf16 to vector<64x3xbf16>
    %35 = vector.shape_cast %33 : vector<64x1xi1> to vector<64x1xi1>
    %36 = vector.broadcast %35 : vector<64x1xi1> to vector<64x3xi1>
    %37 = arith.select %36, %31, %34 : vector<64x3xi1>, vector<64x3xbf16>
    %38 = tpu.concatenate %29, %30, %37 in 1 : vector<64x3xbf16>, vector<64x3xbf16>, vector<64x3xbf16> -> vector<64x9xbf16>
    %c0_15 = arith.constant 0 : index
    %c0_16 = arith.constant 0 : index
    %c0_17 = arith.constant 0 : index
    %39 = vector.load %arg2[%c0_15, %c0_16, %c0_17] : memref<3x9x64xbf16, #tpu.memory_space<vmem>>, vector<1x9x64xbf16>
    %40 = vector.shape_cast %39 : vector<1x9x64xbf16> to vector<9x64xbf16>
    %cst_18 = arith.constant dense<0.000000e+00> : vector<64x64xf32>
    %41 = tpu.matmul %38, %40, %cst_18 {dimension_numbers = #tpu.dot_dimension_numbers<[1], [0], [0], [1], [0, 0, 1, 1], [], []>} : vector<64x9xbf16>, vector<9x64xbf16>, vector<64x64xf32> -> vector<64x64xf32>
    %c15 = arith.constant 15 : index
    %c0_19 = arith.constant 0 : index
    %42 = vector.load %arg5[%c15, %c0_19] : memref<96x3xbf16, #tpu.memory_space<vmem>>, vector<64x3xbf16>
    %c0_i32_20 = arith.constant 0 : i32
    %43 = vector.broadcast %c0_i32_20 : i32 to vector<64x1xi32>
    %44 = arith.cmpi sgt, %22, %43 : vector<64x1xi32>
    %cst_21 = arith.constant 0.000000e+00 : bf16
    %45 = vector.broadcast %cst_21 : bf16 to vector<64x3xbf16>
    %46 = vector.shape_cast %44 : vector<64x1xi1> to vector<64x1xi1>
    %47 = vector.broadcast %46 : vector<64x1xi1> to vector<64x3xi1>
    %48 = arith.select %47, %42, %45 : vector<64x3xi1>, vector<64x3xbf16>
    %c16_22 = arith.constant 16 : index
    %c0_23 = arith.constant 0 : index
    %49 = vector.load %arg5[%c16_22, %c0_23] : memref<96x3xbf16, #tpu.memory_space<vmem>>, vector<64x3xbf16>
    %c17 = arith.constant 17 : index
    %c0_24 = arith.constant 0 : index
    %50 = vector.load %arg5[%c17, %c0_24] : memref<96x3xbf16, #tpu.memory_space<vmem>>, vector<64x3xbf16>
    %c7_i32_25 = arith.constant 7 : i32
    %51 = vector.broadcast %c7_i32_25 : i32 to vector<64x1xi32>
    %52 = arith.cmpi slt, %22, %51 : vector<64x1xi32>
    %cst_26 = arith.constant 0.000000e+00 : bf16
    %53 = vector.broadcast %cst_26 : bf16 to vector<64x3xbf16>
    %54 = vector.shape_cast %52 : vector<64x1xi1> to vector<64x1xi1>
    %55 = vector.broadcast %54 : vector<64x1xi1> to vector<64x3xi1>
    %56 = arith.select %55, %50, %53 : vector<64x3xi1>, vector<64x3xbf16>
    %57 = tpu.concatenate %48, %49, %56 in 1 : vector<64x3xbf16>, vector<64x3xbf16>, vector<64x3xbf16> -> vector<64x9xbf16>
    %c1 = arith.constant 1 : index
    %c0_27 = arith.constant 0 : index
    %c0_28 = arith.constant 0 : index
    %58 = vector.load %arg2[%c1, %c0_27, %c0_28] : memref<3x9x64xbf16, #tpu.memory_space<vmem>>, vector<1x9x64xbf16>
    %59 = vector.shape_cast %58 : vector<1x9x64xbf16> to vector<9x64xbf16>
    %cst_29 = arith.constant dense<0.000000e+00> : vector<64x64xf32>
    %60 = tpu.matmul %57, %59, %cst_29 {dimension_numbers = #tpu.dot_dimension_numbers<[1], [0], [0], [1], [0, 0, 1, 1], [], []>} : vector<64x9xbf16>, vector<9x64xbf16>, vector<64x64xf32> -> vector<64x64xf32>
    %61 = arith.addf %41, %60 : vector<64x64xf32>
    %c23 = arith.constant 23 : index
    %c0_30 = arith.constant 0 : index
    %62 = vector.load %arg5[%c23, %c0_30] : memref<96x3xbf16, #tpu.memory_space<vmem>>, vector<64x3xbf16>
    %c0_i32_31 = arith.constant 0 : i32
    %63 = vector.broadcast %c0_i32_31 : i32 to vector<64x1xi32>
    %64 = arith.cmpi sgt, %22, %63 : vector<64x1xi32>
    %cst_32 = arith.constant 0.000000e+00 : bf16
    %65 = vector.broadcast %cst_32 : bf16 to vector<64x3xbf16>
    %66 = vector.shape_cast %64 : vector<64x1xi1> to vector<64x1xi1>
    %67 = vector.broadcast %66 : vector<64x1xi1> to vector<64x3xi1>
    %68 = arith.select %67, %62, %65 : vector<64x3xi1>, vector<64x3xbf16>
    %c24 = arith.constant 24 : index
    %c0_33 = arith.constant 0 : index
    %69 = vector.load %arg5[%c24, %c0_33] : memref<96x3xbf16, #tpu.memory_space<vmem>>, vector<64x3xbf16>
    %c25 = arith.constant 25 : index
    %c0_34 = arith.constant 0 : index
    %70 = vector.load %arg5[%c25, %c0_34] : memref<96x3xbf16, #tpu.memory_space<vmem>>, vector<64x3xbf16>
    %c7_i32_35 = arith.constant 7 : i32
    %71 = vector.broadcast %c7_i32_35 : i32 to vector<64x1xi32>
    %72 = arith.cmpi slt, %22, %71 : vector<64x1xi32>
    %cst_36 = arith.constant 0.000000e+00 : bf16
    %73 = vector.broadcast %cst_36 : bf16 to vector<64x3xbf16>
    %74 = vector.shape_cast %72 : vector<64x1xi1> to vector<64x1xi1>
    %75 = vector.broadcast %74 : vector<64x1xi1> to vector<64x3xi1>
    %76 = arith.select %75, %70, %73 : vector<64x3xi1>, vector<64x3xbf16>
    %77 = tpu.concatenate %68, %69, %76 in 1 : vector<64x3xbf16>, vector<64x3xbf16>, vector<64x3xbf16> -> vector<64x9xbf16>
    %c2 = arith.constant 2 : index
    %c0_37 = arith.constant 0 : index
    %c0_38 = arith.constant 0 : index
    %78 = vector.load %arg2[%c2, %c0_37, %c0_38] : memref<3x9x64xbf16, #tpu.memory_space<vmem>>, vector<1x9x64xbf16>
    %79 = vector.shape_cast %78 : vector<1x9x64xbf16> to vector<9x64xbf16>
    %cst_39 = arith.constant dense<0.000000e+00> : vector<64x64xf32>
    %80 = tpu.matmul %77, %79, %cst_39 {dimension_numbers = #tpu.dot_dimension_numbers<[1], [0], [0], [1], [0, 0, 1, 1], [], []>} : vector<64x9xbf16>, vector<9x64xbf16>, vector<64x64xf32> -> vector<64x64xf32>
    %81 = arith.addf %61, %80 : vector<64x64xf32>
    %c0_40 = arith.constant 0 : index
    %c0_41 = arith.constant 0 : index
    %82 = vector.load %arg3[%c0_40, %c0_41] : memref<1x64xf32, #tpu.memory_space<vmem>>, vector<1x64xf32>
    %83 = vector.broadcast %82 : vector<1x64xf32> to vector<64x64xf32>
    %84 = arith.addf %81, %83 : vector<64x64xf32>
    %85 = arith.truncf %84 : vector<64x64xf32> to vector<64x64xbf16>
    %c0_42 = arith.constant 0 : index
    %c0_43 = arith.constant 0 : index
    %c0_44 = arith.constant 0 : index
    %86 = vector.load %arg4[%c0_42, %c0_43, %c0_44] : memref<1x64x64xbf16, #tpu.memory_space<vmem>>, vector<1x64x64xbf16>
    %87 = vector.shape_cast %86 : vector<1x64x64xbf16> to vector<64x64xbf16>
    %88 = vector.shape_cast %85 : vector<64x64xbf16> to vector<1x64x64xbf16>
    tpu.vector_store %arg4[%c0_42, %c0_43, %c0_44], %88 {strides = array<i32>} : memref<1x64x64xbf16, #tpu.memory_space<vmem>>, vector<1x64x64xbf16>,
    return
  }
  func.func @transform_0(%arg0: i32) -> (i32, i32, i32) {
    %c0_i32 = arith.constant 0 : i32
    %c0_i32_0 = arith.constant 0 : i32
    %c0_i32_1 = arith.constant 0 : i32
    return %arg0, %c0_i32, %c0_i32_0 : i32, i32, i32
  }
  func.func @transform_1(%arg0: i32) -> (i32, i32, i32) {
    %c0_i32 = arith.constant 0 : i32
    %c0_i32_0 = arith.constant 0 : i32
    %c0_i32_1 = arith.constant 0 : i32
    %c0_i32_2 = arith.constant 0 : i32
    return %c0_i32, %c0_i32_0, %c0_i32_1 : i32, i32, i32
  }
  func.func @transform_2(%arg0: i32) -> (i32, i32) {
    %c0_i32 = arith.constant 0 : i32
    %c0_i32_0 = arith.constant 0 : i32
    %c0_i32_1 = arith.constant 0 : i32
    return %c0_i32, %c0_i32_0 : i32, i32
  }
  func.func @transform_3(%arg0: i32) -> (i32, i32, i32) {
    %c0_i32 = arith.constant 0 : i32
    %c0_i32_0 = arith.constant 0 : i32
    %c0_i32_1 = arith.constant 0 : i32
    return %arg0, %c0_i32, %c0_i32_0 : i32, i32, i32
  }
}

</mosaic_0001>

<bundles_post_ra>
// kernel: _lambda_.1
= control target key start
LH: loop header
LB: loop body
LE: loop exit
PB: predicated region body
PF: predicated region fallthrough
CT: control target
= control target key end

     0   :  { %8 = vsyncpa [#allocation4], 0  ;;  %s2169_s0 = inlined_call_operand.vmem [shape: bf16[2,64,3], index: 0, kind: input, shape index: {}]   ;;  %s2170_s1 = inlined_call_operand.vmem [shape: bf16[3,9,64], index: 1, kind: input, shape index: {}]   ;;  %s2171_s2 = inlined_call_operand.vmem [shape: f32[1,64], index: 2, kind: input, shape index: {}]   ;;  %s2172_s3 = inlined_call_operand.hbm [shape: bf16[2,64,64], index: 3, kind: output, shape index: {}]  }
   0x1   :  { %10 = vsyncpa [#allocation4 + $0x1], 0  ;;  %s1595_s12 = smov 0   ;;  %s1597_s13 = smov 0  }
   0x2   :  { %s1599_s14 = smov 0   ;;  %s1601_s15 = smov 0  }
   0x3 LB: > { %s1616_s16 = sadd.s32 4294967295, %s1566_s15   ;;  %s1327_s17 = sadd.s32 4294967294, %s1566_s15   ;;  %s1566_s15 = sphi %s1601_s15, %s2192_s15   ;;  %s1562_s14 = sphi %s1599_s14, %s2191_s14   ;;  %s1558_s13 = sphi %s1597_s13, %s2190_s13   ;;  %s1554_s12 = sphi %s1595_s12, %s2189_s12  }
   0x4   : > { %s1620_s18 = sadd.s32 1, %s1566_s15   ;;  %s91_s19 = sadd.s32 1, %s1562_s14 }
   0x5   : > { %s88_s20 = ssub.s32 %s1566_s15, %s1620_s18  ;;  %p101_p0 = scmp.ne.s32.totalorder %s1562_s14, %s1558_s13 }
   0x6   : > { %p89_p1 = scmp.eq.s32.totalorder %s88_s20, 0  ;;  %p102_p2 = scmp.eq.s32.totalorder %s1616_s16, 1 }
   0x7   : > { %p107_p3 = scmp.ne.s32.totalorder %s1558_s13, %s1554_s12  ;;  %p108_p4 = scmp.eq.s32.totalorder %s1327_s17, 1 }
   0x8   : > { %s1631_s21 = scalar_select %p89_p1, %s1562_s14, %s91_s19  }
   0x9   : > { %p1633_p5 = por %p102_p2, %p101_p0  ;;  %p1637_p6 = por %p108_p4, %p107_p3 }
   0xa   : > { %p1330_p7 = scmp.ge.s32.totalorder %s1566_s15, 1  ;;  %p140_p8 = scmp.lt.s32.totalorder %s1566_s15, 3 }
   0xc   : > { %p141_p9 = pnand %p1330_p7, %p140_p8 }
   0xd   : > { %p164_p10 = scmp.lt.s32.totalorder (!%p141_p9), %s1616_s16, 1  ;;  %vm172_vm0 = vcmask (!%p141_p9), 23552   ;;  %v211_v0 = vlaneseq (!%p141_p9)  ;;  %v1568_v1 = vmov (!%p141_p9), 0   ;;  %vm519_vm5 = vsmask.f32 (!%p141_p9), 7424  ;;  %s1569_s29 = smov (!%p141_p9), 3  }
   0xe   : > { %144 = sbr.rel (%p141_p9) target bundleno = 446 (0x1be), region = 32  ;;  %173 = vst.msk [vmem:[#allocation2] sm:$0xff] (!%p141_p9), %vm172_vm0, %v1568_v1  ;;  %174 = vst.msk [vmem:[#allocation2 + $0x28] sm:$0xff] (!%p141_p9), %vm172_vm0, %v1568_v1  ;;  %vm473_vm15 = vsmask.f32 (!%p141_p9), 4352  ;;  %s1570_s30 = smov (!%p141_p9), 6  }
   0xf   : > { %v1649_v2 = vshrl.u32 (!%p141_p9), %v211_v0, 7  ;;  %s161_s10 = sand.u32 (!%p141_p9), 1, %s1558_s13  }
  0x10   : > { %s1331_s19 = sshll.u32 (!%p141_p9), %s161_s10, 5 }
  0x11   : > { %v1652_v3 = vadd.s32 (!%p141_p9), 8, %v1649_v2  ;;  %v224_v4 = vand.u32 (!%p141_p9), 7, %v1649_v2  ;;  %v1656_v5 = vadd.s32 (!%p141_p9), 16, %v1649_v2  ;;  %v1659_v6 = vadd.s32 (!%p141_p9), 24, %v1649_v2  ;;  %s2099_s20 = scalar_lea.vmem (!%p141_p9), [#allocation3], %s1331_s19 }
  0x12   : > { %v1665_v7 = vadd.s32 (!%p141_p9), 32, %v1649_v2  ;;  %v1668_v8 = vadd.s32 (!%p141_p9), 40, %v1649_v2  ;;  %v1671_v9 = vadd.s32 (!%p141_p9), 48, %v1649_v2  ;;  %v1674_v10 = vadd.s32 (!%p141_p9), 56, %v1649_v2 }
  0x13   : > { %v231_v12 = vand.u32 (!%p141_p9), 7, %v1652_v3  ;;  %vm421_vm1 = vcmp.lt.s32.totalorder (!%p141_p9), %v224_v4, 7  ;;  %v238_v15 = vand.u32 (!%p141_p9), 7, %v1656_v5  ;;  %v245_v24 = vand.u32 (!%p141_p9), 7, %v1659_v6 }
  0x14   : > { %vm445_vm3 = vmpackc.low (!%p141_p9), %vm421_vm1, %vm421_vm1  ;;  %v252_v25 = vand.u32 (!%p141_p9), 7, %v1665_v7  ;;  %v259_v26 = vand.u32 (!%p141_p9), 7, %v1668_v8  ;;  %v266_v27 = vand.u32 (!%p141_p9), 7, %v1671_v9  ;;  %v273_v30 = vand.u32 (!%p141_p9), 7, %v1674_v10 }
  0x15   : > { %s165_s24 = scalar_select %p164_p10, %s1616_s16, 1  ;;  %v1680_v14 = vld [vmem:[#allocation2] sm:$0xf0]  ;;  %vm422_vm2 = vcmp.lt.s32.totalorder %v231_v12, 7  ;;  %v453_v18 = vsel %vm445_vm3, 65537, %v1568_v1  ;;  %vm423_vm6 = vcmp.lt.s32.totalorder %v238_v15, 7 }
  0x16   : > { %v521_v16 = vshrl.u32 %v1680_v14, 16  ;;  %v523_v17 = vshll.u32 %v1680_v14, 16  ;;  %vm446_vm4 = vmpackc.low %vm422_vm2, %vm422_vm2  ;;  %vm424_vm7 = vcmp.lt.s32.totalorder %v245_v24, 7  ;;  %vm1703_vm9 = vcmp.lt.s32.totalorder %v252_v25, 7 }
  0x17   : > { %s1379_s25 = sshll.u32 %s165_s24, 5  ;;  %v454_v20 = vsel %vm446_vm4, 65537, %v1568_v1  ;;  %vm447_vm8 = vmpackc.low %vm423_vm6, %vm423_vm6  ;;  %vm1709_vm10 = vcmp.lt.s32.totalorder %v259_v26, 7  ;;  %vm1724_vm13 = vcmp.lt.s32.totalorder %v266_v27, 7  ;;  %vm574_vm3 = vcmask 1046528   ;;  %s1388_s24 = sshll.u32 %s1616_s16, 9 }
  0x18   : > { %s168_s28 = scalar_lea.vmem %s2169_s0, %s1379_s25  ;;  %v525_v22 = vrot.slane %v523_v17, 1  ;;  %v1342_v23 = vcombine.low %v453_v18, %v454_v20  ;;  %vm448_vm11 = vmpackc.low %vm424_vm7, %vm424_vm7  ;;  %v455_v34 = vsel %vm447_vm8, 65537, %v1568_v1  ;;  %vm428_vm6 = vcmp.lt.s32.totalorder %v273_v30, 7  ;;  %s1265_s25 = sshll.u32 %s2099_s20, 4  ;;  %s2118_s25 = int_to_ptr.vmem [resolvable:$true] %s1265_s25 }
  0x19   : > { %v1497_v11 = vld [vmem:[%s168_s28] sm:$0xff]   ;;  %v1498_v13 = vld [vmem:[%s168_s28 + $0x8] sm:$0xff]   ;;  %v1499_v19 = vld [vmem:[%s168_s28 + $0x18] sm:$0xff]   ;;  %v456_v38 = vsel %vm448_vm11, 65537, %v1568_v1  ;;  %vm646_vm8 = vsmask.f32 256 }
  0x1a   : > { %207 = vst.msk [vmem:[#allocation2 + $0x8] sm:$0xff] %vm172_vm0, %v1497_v11  ;;  %208 = vst.msk [vmem:[#allocation2 + $0x10] sm:$0xff] %vm172_vm0, %v1498_v13  ;;  %v1500_v21 = vld [vmem:[%s168_s28 + $0x10] sm:$0xff]   ;;  %v475_v28 = vshrl.u32 %v1342_v23, 16  ;;  %v478_v29 = vshll.u32 %v1342_v23, 16  ;;  %v526_v31 = vor.u32 %v525_v22, %v521_v16  ;;  %v1735_v44 = vcombine.low %v455_v34, %v456_v38  ;;  %s2116_s28 = scalar_lea.hbm %s2172_s3, %s1388_s24  ;;  %s2128_s16 = scalar_lea.sflag [#allocation4], %s161_s10 }
  0x1b   : > { %210 = vst.msk [vmem:[#allocation2 + $0x20] sm:$0xff] %vm172_vm0, %v1499_v19  ;;  %209 = vst.msk [vmem:[#allocation2 + $0x18] sm:$0xff] %vm172_vm0, %v1500_v21 }
  0x1c   : > { %v477_v36 = vrot.slane %v475_v28, 3  ;;  %v1716_v37 = vrot.slane %v475_v28, 7  ;;  %vm449_vm12 = vmpackc.low %vm1703_vm9, %vm1703_vm9  ;;  %v480_v41 = vrot.slane %v478_v29, 4  ;;  %v483_v52 = vshrl.u32 %v1735_v44, 16 }
  0x1d   : > { %vm450_vm14 = vmpackc.low %vm1709_vm10, %vm1709_vm10  ;;  %v457_v48 = vsel %vm449_vm12, 65537, %v1568_v1  ;;  %v486_v53 = vshll.u32 %v1735_v44, 16 }
  0x1e   : > { %v648_v45 = vor.u32 %v1716_v37, %v478_v29  ;;  %v458_v51 = vsel %vm450_vm14, 65537, %v1568_v1  ;;  %v481_v62 = vor.u32 %v480_v41, %v477_v36  ;;  %v485_v18 = vrot.slane %v483_v52, 3  ;;  %vm451_vm2 = vmpackc.low %vm1724_vm13, %vm1724_vm13 }
  0x1f   : > { %v1344_v17 = vcombine.low %v457_v48, %v458_v51  ;;  %v488_v20 = vrot.slane %v486_v53, 4  ;;  %vm452_vm7 = vmpackc.low %vm428_vm6, %vm428_vm6  ;;  %v459_v32 = vsel %vm451_vm2, 65537, %v1568_v1  ;;  %vm322_vm6 = vcmp.gt.s32.totalorder %v231_v12, 0 }
  0x20   : > { %vm658_vm1 = vcmp.ne.s16.totalorder %v648_v45, 0  ;;  %vm509_vm4 = vcmp.ne.s16.totalorder %v481_v62, 0  ;;  %v460_v33 = vsel %vm452_vm7, 65537, %v1568_v1 }
  0x21   : > { %v1714_v35 = vld [vmem:[#allocation2 + $0x8] sm:$0xff]  ;;  %v1729_v42 = vld [vmem:[#allocation2 + $0x10] sm:$0xff]  ;;  %v492_v23 = vshrl.u32 %v1344_v17, 16  ;;  %v495_v28 = vshll.u32 %v1344_v17, 16  ;;  %v489_v29 = vor.u32 %v488_v20, %v485_v18  ;;  %v1345_v41 = vcombine.low %v459_v32, %v460_v33 }
  0x22   : > { %v528_v40 = vshll.u32 %v1714_v35, 16  ;;  %v532_v43 = vshrl.u32 %v1714_v35, 16  ;;  %v536_v46 = vshll.u32 %v1729_v42, 16  ;;  %v540_v47 = vshrl.u32 %v1729_v42, 16  ;;  %v1741_v50 = vld [vmem:[#allocation2 + $0x20] sm:$0xff]  ;;  %v1750_v57 = vld [vmem:[#allocation2 + $0x18] sm:$0xff] }
  0x23   : > { %v669_v55 = vshll.u32 %v1741_v50, 16  ;;  %v673_v56 = vshrl.u32 %v1741_v50, 16  ;;  %v1755_v59 = vsel %vm658_vm1, %v1714_v35, 0  ;;  %v544_v61 = vshll.u32 %v1750_v57, 16  ;;  %v984_v51 = vld [vmem:[#allocation2 + $0x8] sm:$0xf0] }
  0x24   : > { %v530_v49 = vrot.slane %v528_v40, 1  ;;  %v1746_v54 = vrot.slane %v536_v46, 1  ;;  %v687_v63 = vrot.slane %v1755_v59, 1  ;;  %v548_v11 = vshrl.u32 %v1750_v57, 16  ;;  %v645_v20 = vld [vmem:[#allocation2 + $0x28] sm:$0x1] }
  0x25   : > { %v671_v0 = vrot.slane %v669_v55, 1  ;;  %v546_v16 = vrot.slane %v544_v61, 1  ;;  %v494_v36 = vrot.slane %v492_v23, 3  ;;  %v497_v38 = vrot.slane %v495_v28, 4  ;;  %v1828_v59 = vld [vmem:[#allocation2 + $0x20] sm:$0xf] }
  0x26   : > { %676 = vrot.lane.b32.xlu1 %v530_v49, %s1569_s29  ;;  %v531_v58 = vsel %vm519_vm5, %v526_v31, %v530_v49  ;;  %v534_v60 = vor.u32 %v532_v43, %v530_v49  ;;  %v542_v19 = vor.u32 %v540_v47, %v1746_v54  ;;  %v514_v31 = vsel %vm509_vm4, %v1680_v14, 0 }
  0x27   : > { %559 = vrot.lane.b32.xlu0 %v531_v58, %s1569_s29  ;;  %v1772_v21 = vor.u32 %v673_v56, %v671_v0  ;;  %v1774_v22 = vor.u32 %v548_v11, %v546_v16  ;;  %v490_v40 = vsel %vm473_vm15, %v481_v62, %v489_v29  ;;  %v649_v43 = vrot.slane %v483_v52, 7 }
  0x28   : > { %v539_v13 = vsel %vm519_vm5, %v534_v60, %v1746_v54  ;;  %v652_v14 = vrot.slane %v492_v23, 7  ;;  %v547_v39 = vsel %vm519_vm5, %v542_v19, %v546_v16  ;;  %v498_v44 = vor.u32 %v497_v38, %v494_v36 }
  0x29   : > { %v672_v34 = vsel %vm519_vm5, %v1774_v22, %v671_v0  ;;  %vm510_vm9 = vcmp.ne.s16.totalorder %v490_v40, 0  ;;  %v575_v45 = vrot.slane %v514_v31, 1  ;;  %v501_v47 = vshrl.u32 %v1345_v41, 16 }
  0x2a   : > { %696 = vrot.lane.b32.xlu1 %v687_v63, %s1570_s30  ;;  %v515_v46 = vsel %vm510_vm9, %v1714_v35, 0  ;;  %v504_v48 = vshll.u32 %v1345_v41, 16  ;;  %v650_v49 = vor.u32 %v649_v43, %v486_v53  ;;  %v499_v52 = vsel %vm473_vm15, %v489_v29, %v498_v44 }
  0x2b   : > { %561 = vrot.lane.b32.xlu0 %v539_v13, %s1569_s29  ;;  %v576_v55 = vrot.slane %v515_v46, 1  ;;  %v653_v56 = vor.u32 %v652_v14, %v495_v28  ;;  %v986_v58 = vsel %vm509_vm4, %v984_v51, 0  ;;  %vm511_vm10 = vcmp.ne.s16.totalorder %v499_v52, 0 }
  0x2c   : > { %v503_v60 = vrot.slane %v501_v47, 3  ;;  %v506_v61 = vrot.slane %v504_v48, 4  ;;  %v651_v0 = vsel %vm646_vm8, %v1716_v37, %v650_v49  ;;  %v516_v11 = vsel %vm511_vm10, %v1729_v42, 0 }
  0x2d   : > { %v577_v53 = vsel %vm574_vm3, %v575_v45, %v576_v55  ;;  %vm659_vm11 = vcmp.ne.s16.totalorder %v651_v0, 0  ;;  %v654_v13 = vsel %vm646_vm8, %v649_v43, %v653_v56  ;;  %v578_v16 = vrot.slane %v516_v11, 1  ;;  %v420_v56 = vld [vmem:[#allocation2 + $0x20] sm:$0x1f]  ;;  %v985_v0 = vld [vmem:[#allocation2 + $0x28] sm:$0x1f] }
  0x2e   : > { %680 = vrot.lane.b32.xlu1 %v1772_v21, %s1569_s29  ;;  %v507_v17 = vor.u32 %v506_v61, %v503_v60  ;;  %v664_v62 = vsel %vm659_vm11, %v1729_v42, 0  ;;  %vm660_vm12 = vcmp.ne.s16.totalorder %v654_v13, 0  ;;  %v655_v37 = vrot.slane %v501_v47, 7 }
  0x2f   : > { %678 = vrot.lane.b32.xlu0 %v672_v34, %s1569_s29  ;;  %v688_v18 = vrot.slane %v664_v62, 1  ;;  %v665_v19 = vsel %vm660_vm12, %v1750_v57, 0  ;;  %v579_v23 = vsel %vm574_vm3, %v576_v55, %v578_v16  ;;  %v987_v29 = vsel %vm510_vm9, %v1729_v42, 0  ;;  %v1812_v34 = vld [vmem:[#allocation2 + $0x28] sm:$0xf]  ;;  %vm346_vm9 = vmpackc.low %vm322_vm6, %vm322_vm6 }
  0x30   : > { %v508_v28 = vsel %vm473_vm15, %v498_v44, %v507_v17  ;;  %v992_v31 = vshrl.u32 %v984_v51, 16  ;;  %v656_v32 = vor.u32 %v655_v37, %v504_v48  ;;  %vm662_vm14 = vcmp.ne.s16.totalorder %v655_v37, 0 }
  0x31   : > { %vm512_vm13 = vcmp.ne.s16.totalorder %v508_v28, 0  ;;  %v1018_v33 = vrot.slane %v986_v58, 1  ;;  %v689_v38 = vsel %vm574_vm3, %v687_v63, %v688_v18  ;;  %v690_v40 = vrot.slane %v665_v19, 1 }
  0x32   : > { %563 = vrot.lane.b32.xlu1 %v547_v39, %s1569_s29  ;;  %v1815_v36 = vsel %vm512_vm13, %v1750_v57, 0  ;;  %v667_v41 = vsel %vm662_vm14, %v645_v20, 0  ;;  %v657_v39 = vsel %vm646_vm8, %v652_v14, %v656_v32  ;;  %v994_v45 = vshll.u32 %v984_v51, 16 }
  0x33   : > { %586 = vrot.lane.b32.xlu0 %v579_v23, %s1570_s30  ;;  %v580_v43 = vrot.slane %v1815_v36, 1  ;;  %v694_v44 = vrot.slane %v667_v41, 1  ;;  %vm661_vm1 = vcmp.ne.s16.totalorder %v657_v39, 0  ;;  %v988_v46 = vsel %vm511_vm10, %v1750_v57, 0 }
  0x34   : > { %v1825_v47 = vsel %vm512_vm13, %v1741_v50, 0  ;;  %v1000_v48 = vshll.u32 %v1812_v34, 16  ;;  %v666_v14 = vsel %vm661_vm1, %v1741_v50, 0  ;;  %v1019_v49 = vrot.slane %v987_v29, 1 }
  0x35   : > { %v581_v63 = vsel %vm574_vm3, %v578_v16, %v580_v43  ;;  %v996_v51 = vrot.slane %v994_v45, 1  ;;  %v692_v52 = vrot.slane %v666_v14, 1  ;;  %v1021_v55 = vrot.slane %v988_v46, 1 }
  0x36   : > { %584 = vrot.lane.b32.xlu1 %v577_v53, %s1570_s30  ;;  %v691_v58 = vsel %vm574_vm3, %v688_v18, %v690_v40  ;;  %v1023_v60 = vrot.slane %v1825_v47, 1  ;;  %v552_v61 = vshll.u32 %v1828_v59, 16  ;;  %vm513_vm2 = vcmp.ne.s16.totalorder %v507_v17, 0 }
  0x37   : > { %588 = vrot.lane.b32.xlu0 %v581_v63, %s1570_s30  ;;  %v695_v11 = vsel %vm574_vm3, %v692_v52, %v694_v44  ;;  %v997_v53 = vor.u32 %v996_v51, %v992_v31  ;;  %v1840_v13 = vrot.slane %v1000_v48, 1  ;;  %v1020_v16 = vsel %vm574_vm3, %v1018_v33, %v1019_v49 }
  0x38   : > { %v1844_v62 = vsel %vm513_vm2, %v420_v56, 0  ;;  %v1022_v18 = vsel %vm574_vm3, %v1019_v49, %v1021_v55  ;;  %v556_v19 = vshrl.u32 %v1828_v59, 16  ;;  %v1849_v20 = vsel %vm513_vm2, %v985_v0, 0 }
  0x39   : > { %vm321_vm4 = vcmp.gt.s32.totalorder %v224_v4, 0  ;;  %v693_v17 = vsel %vm574_vm3, %v690_v40, %v692_v52  ;;  %v1024_v37 = vsel %vm574_vm3, %v1021_v55, %v1023_v60  ;;  %v554_v23 = vrot.slane %v552_v61, 1 }
  0x3a   : > { %698 = vrot.lane.b32.xlu1 %v689_v38, %s1570_s30  ;;  %vm345_vm7 = vmpackc.low %vm321_vm4, %vm321_vm4  ;;  %v998_v28 = vsel %vm519_vm5, %v997_v53, %v1746_v54  ;;  %v1003_v29 = vsel %vm519_vm5, %v1772_v21, %v1840_v13  ;;  %v582_v31 = vrot.slane %v1844_v62, 1  ;;  %v1025_v4 = vrot.slane %v1849_v20, 1 }
  0x3b   : > { %700 = vrot.lane.b32.xlu0 %v691_v58, %s1570_s30  ;;  %v353_v2 = vsel %vm345_vm7, 65537, %v1568_v1  ;;  %v354_v3 = vsel %vm346_vm9, 65537, %v1568_v1  ;;  %vm323_vm10 = vcmp.gt.s32.totalorder %v238_v15, 0  ;;  %vm324_vm11 = vcmp.gt.s32.totalorder %v245_v24, 0  ;;  %v1501_v58 = vld [vmem:[%s2170_s1] sm:$0x1f]  }
  0x3c   : > { %v1004_v12 = vshrl.u32 %v1812_v34, 16  ;;  %v1338_v54 = vcombine.low %v353_v2, %v354_v3  ;;  %vm347_vm12 = vmpackc.low %vm323_vm10, %vm323_vm10  ;;  %vm1875_vm13 = vcmp.gt.s32.totalorder %v266_v27, 0  ;;  %vm1881_vm14 = vcmp.gt.s32.totalorder %v273_v30, 0 }
  0x3d   : > { %v555_v6 = vsel %vm519_vm5, %v1774_v22, %v554_v23  ;;  %v1887_v15 = vor.u32 %v556_v19, %v554_v23  ;;  %vm348_vm1 = vmpackc.low %vm324_vm11, %vm324_vm11  ;;  %v355_v24 = vsel %vm347_vm12, 65537, %v1568_v1  ;;  %vm1892_vm2 = vcmp.gt.s32.totalorder %v252_v25, 0 }
  0x3e   : > { %704 = vrot.lane.b32.xlu1 %v695_v11, %s1570_s30  ;;  %v375_v27 = vshrl.u32 %v1338_v54, 16  ;;  %v378_v10 = vshll.u32 %v1338_v54, 16  ;;  %v356_v30 = vsel %vm348_vm1, 65537, %v1568_v1  ;;  %vm351_vm4 = vmpackc.low %vm1875_vm13, %vm1875_vm13  ;;  %vm1902_vm6 = vcmp.gt.s32.totalorder %v259_v26, 0  ;;  %v1502_v11 = vld [vmem:[%s2170_s1 + $0x8] sm:$0x1f]  }
  0x3f   : > { %702 = vrot.lane.b32.xlu0 %v693_v17, %s1570_s30  ;;  %v583_v7 = vsel %vm574_vm3, %v580_v43, %v582_v31  ;;  %v1026_v25 = vsel %vm574_vm3, %v1023_v60, %v1025_v4  ;;  %v1339_v32 = vcombine.low %v355_v24, %v356_v30  ;;  %vm352_vm7 = vmpackc.low %vm1881_vm14, %vm1881_vm14  ;;  %v359_v8 = vsel %vm351_vm4, 65537, %v1568_v1 }
  0x40   : > { %v1920_v26 = vrot.slane %v378_v10, 1  ;;  %v377_v33 = vrot.slane %v375_v27, 4  ;;  %v380_v38 = vrot.slane %v378_v10, 5  ;;  %v360_v36 = vsel %vm352_vm7, 65537, %v1568_v1  ;;  %vm349_vm9 = vmpackc.low %vm1892_vm2, %vm1892_vm2 }
  0x41   : > { %v383_v40 = vshrl.u32 %v1339_v32, 16  ;;  %v386_v41 = vshll.u32 %v1339_v32, 16  ;;  %v1341_v43 = vcombine.low %v359_v8, %v360_v36  ;;  %vm350_vm3 = vmpackc.low %vm1902_vm6, %vm1902_vm6  ;;  %v357_v39 = vsel %vm349_vm9, 65537, %v1568_v1 }
  0x42   : > { %1027 = vrot.lane.b32.xlu1 %v1020_v16, %s1570_s30  ;;  %v625_v44 = vor.u32 %v1920_v26, %v375_v27  ;;  %v358_v45 = vsel %vm350_vm3, 65537, %v1568_v1  ;;  %vm781_vm10 = vcmask 1043456   ;;  %vm373_vm11 = vsmask.f32 3328 }
  0x43   : > { %1007 = vrot.lane.b32.xlu0 %v998_v28, %s1569_s29  ;;  %v385_v46 = vrot.slane %v383_v40, 4  ;;  %v388_v47 = vrot.slane %v386_v41, 5  ;;  %v626_v48 = vrot.slane %v386_v41, 1  ;;  %v401_v63 = vshrl.u32 %v1341_v43, 16  ;;  %v1503_v28 = vld [vmem:[%s2170_s1 + $0x10] sm:$0x1f]  }
  0x44   : > { %v404_v14 = vshll.u32 %v1341_v43, 16  ;;  %v1340_v49 = vcombine.low %v357_v39, %v358_v45  ;;  %vm782_vm12 = vcmask 1044480   ;;  %v1934_v51 = vor.u32 %v380_v38, %v377_v33  ;;  %v622_v39 = vld [vmem:[#allocation2] sm:$0x80] }
  0x45   : > { %v389_v52 = vor.u32 %v388_v47, %v385_v46  ;;  %v627_v55 = vsel %vm519_vm5, %v625_v44, %v626_v48  ;;  %v1571_v56 = vmov 65535   ;;  %v403_v60 = vrot.slane %v401_v63, 4 }
  0x46   : > { %1031 = vrot.lane.b32.xlu1 %v1024_v37, %s1570_s30  ;;  %v783_v1 = vsel %vm781_vm10, 4294967295, %v1571_v56  ;;  %vm636_vm13 = vcmp.ne.s16.totalorder %v627_v55, 0  ;;  %v632_v61 = vrot.slane %v404_v14, 1  ;;  %v628_v0 = vor.u32 %v626_v48, %v383_v40 }
  0x47   : > { %1029 = vrot.lane.b32.xlu0 %v1022_v18, %s1570_s30  ;;  %v390_v53 = vsel %vm373_vm11, %v1934_v51, %v389_v52  ;;  %v1947_v16 = vsel %vm636_vm13, %v1714_v35, 0  ;;  %v392_v18 = vshrl.u32 %v1340_v49, 16  ;;  %v395_v19 = vshll.u32 %v1340_v49, 16 }
  0x48   : > { %vm410_vm14 = vcmp.ne.s16.totalorder %v390_v53, 0  ;;  %v406_v17 = vrot.slane %v404_v14, 5  ;;  %v634_v37 = vor.u32 %v632_v61, %v401_v63  ;;  %v784_v23 = vsel %vm782_vm12, %v783_v1, 0 }
  0x49   : > { %v394_v2 = vrot.slane %v392_v18, 4  ;;  %v397_v3 = vrot.slane %v395_v19, 5  ;;  %v629_v54 = vrot.slane %v395_v19, 1  ;;  %v1956_v21 = vsel %vm410_vm14, %v1729_v42, 0 }
  0x4a   : > { %1009 = vrot.lane.b32.xlu1 %v1003_v29, %s1569_s29  ;;  %v415_v29 = vsel %vm410_vm14, %v1714_v35, 0  ;;  %vm639_vm1 = vcmp.ne.s16.totalorder %v634_v37, 0  ;;  %v1958_v5 = vand.u32 %v1501_v58, %v784_v23  ;;  %v1006_v35 = vor.u32 %v1004_v12, %v1840_v13 }
  0x4b   : > { %565 = vrot.lane.b32.xlu0 %v555_v6, %s1569_s29  ;;  %v786_v6 = vand.u32 %v1502_v11, %v784_v23  ;;  %v1962_v24 = vsel %vm639_vm1, %v1741_v50, 0  ;;  %v398_v9 = vor.u32 %v397_v3, %v394_v2  ;;  %v631_v27 = vor.u32 %v629_v54, %v392_v18 }
  0x4c   : > { %v630_v10 = vsel %vm519_vm5, %v628_v0, %v629_v54  ;;  %1414 = vmatprep.subr.bf16.mxu0 %v1958_v5  ;;  %v407_v30 = vor.u32 %v406_v17, %v403_v60  ;;  %v1971_v22 = vand.u32 %v1503_v28, %v784_v23  ;;  %vm409_vm9 = vcmp.ne.s16.totalorder %v1934_v51, 0 }
  0x4d   : > { %vm637_vm2 = vcmp.ne.s16.totalorder %v630_v10, 0  ;;  %1415 = vmatpush3.bf16.msra.mxu0 %v1958_v5  ;;  %1404 = vmatprep.subr.bf16.mxu1 %v786_v6  ;;  %vm635_vm3 = vcmp.ne.s16.totalorder %v1920_v26, 0  ;;  %vm609_vm10 = vcmask 48128  }
  0x4e   : > { %590 = vrot.lane.b32.xlu1 %v583_v7, %s1570_s30  ;;  %v399_v7 = vsel %vm373_vm11, %v389_v52, %v398_v9  ;;  %v1976_v32 = vsel %vm637_vm2, %v1729_v42, 0  ;;  %1405 = vmatpush3.bf16.msra.mxu1 %v786_v6  ;;  %v408_v13 = vsel %vm373_vm11, %v398_v9, %v407_v30  ;;  %vm413_vm7 = vcmp.ne.s16.totalorder %v407_v30, 0 }
  0x4f   : > { %567 = vrot.lane.b32.xlu0 %v1887_v15, %s1569_s29  ;;  %vm411_vm4 = vcmp.ne.s16.totalorder %v399_v7, 0  ;;  %1424 = vmatprep.subr.bf16.mxu0 %v1971_v22  ;;  %v2000_v20 = vsel %vm413_vm7, %v1828_v59, 0  ;;  %v640_v62 = vsel %vm635_vm3, %v622_v39, 0  ;;  %vm768_vm11 = vcmask 72704  }
  0x50   : > { %v1988_v15 = vsel %vm411_vm4, %v1750_v57, 0  ;;  %v416_v8 = vsel %vm411_vm4, %v1729_v42, 0  ;;  %1434 = vmatprep.subr.bf16.mxu1 %v1958_v5 }
  0x52   : > { %1033 = vrot.lane.b32.xlu1 %v1026_v25, %s1570_s30  ;;  %v633_v25 = vsel %vm519_vm5, %v631_v27, %v632_v61  ;;  %vm412_vm5 = vcmp.ne.s16.totalorder %v408_v13, 0 }
  0x53   : > { %vm638_vm6 = vcmp.ne.s16.totalorder %v633_v25, 0  ;;  %1011 = vrot.lane.b32.xlu0 %v1006_v35, %s1569_s29  ;;  %v1994_v33 = vsel %vm412_vm5, %v1741_v50, 0  ;;  %v1997_v38 = vsel %vm412_vm5, %v1750_v57, 0  ;;  %v316_v50 = vld [vmem:[#allocation2] sm:$0xf8]  ;;  %s1504_s29 = scalar_lea.vmem %s2118_s25, 512 }
  0x54   : > { %v1985_v12 = vsel %vm638_vm6, %v1750_v57, 0  ;;  %p1505_p11 = scmp.ne.s32.totalorder %s2118_s25, %s1504_s29 }
  0x56   : > { %1035 = vrot.lane.b32.xlu1 %v1025_v4, %s1570_s30  ;;  %v2003_v4 = vsel %vm413_vm7, %v1812_v34, 0  ;;  %v414_v34 = vsel %vm409_vm9, %v316_v50, 0  ;;  %p1506_p12 = pnand %p1505_p11, %p1633_p5 }
  0x57   : > { %592 = vrot.lane.b32.xlu0 %v582_v31, %s1570_s30  ;;  %s1572_s30 = smov [#allocation3]  }
  0x58   : > { %p1507_p13 = pneg %p1506_p12  ;;  %s1508_s4 = sshll.u32 %s1572_s30, 4  ;;  %s1509_s4 = int_to_ptr.vmem [resolvable:$false] %s1508_s4 }
  0x59   : > { %s1510_s5 = scalar_lea.vmem %s1509_s4, 1024  ;;  %p1511_p0 = scmp.lt.s32.totalorder %s2118_s25, %s1509_s4 }
  0x5a   : > { %p1512_p1 = scmp.lt.s32.totalorder %s1510_s5, %s1504_s29 }
  0x5c   : > { %p1513_p2 = por %p1512_p1, %p1511_p0 }
  0x5e   : > { %p1514_p3 = pnand %p1513_p2, %p1507_p13 }
  0x98   : > { %v677_v42 = vpop.permute.xlu1 %676 }
  0x99   : > { %v560_v36 = vpop.permute.xlu0 %559  ;;  %v708_v47 = vsel %vm172_vm0, %v640_v62, %v677_v42 }
  0x9a   : > { %v596_v31 = vsel %vm172_vm0, %v414_v34, %v560_v36 }
  0x9c   : > { %v697_v40 = vpop.permute.xlu1 %696 }
  0x9d   : > { %v562_v41 = vpop.permute.xlu0 %561  ;;  %v720_v55 = vsel %vm609_vm10, %v708_v47, %v697_v40 }
  0x9e   : > { %v599_v44 = vsel %vm172_vm0, %v415_v29, %v562_v41  ;;  %v710_v56 = vsel %vm172_vm0, %v1947_v16, %v562_v41  ;;  %v732_v19 = vshrl.u32 %v720_v55, 16 }
  0xa0   : > { %v681_v43 = vpop.permute.xlu1 %680  ;;  %v734_v25 = vrot.slane %v732_v19, 7 }
  0xa1   : > { %v2009_v57 = vpop.permute.xlu0 %678  ;;  %v718_v2 = vsel %vm172_vm0, %v1962_v24, %v681_v43  ;;  %v977_v43 = vld [vmem:[#allocation2 + $0x8] sm:$0xf8] }
  0xa2   : > { %v715_v36 = vsel %vm172_vm0, %v1985_v12, %v2009_v57 }
  0xa4   : > { %v2012_v59 = vpop.permute.xlu1 %563 }
  0xa5   : > { %v587_v45 = vpop.permute.xlu0 %586  ;;  %v602_v11 = vsel %vm172_vm0, %v416_v8, %v2012_v59  ;;  %v712_v3 = vsel %vm172_vm0, %v1976_v32, %v2012_v59 }
  0xa6   : > { %v613_v48 = vsel %vm609_vm10, %v599_v44, %v587_v45 }
  0xa7   : > { %v860_v26 = vshrl.u32 %v613_v48, 16  ;;  %v863_v14 = vshll.u32 %v613_v48, 16  ;;  %v979_v48 = vsel %vm409_vm9, %v977_v43, 0 }
  0xa8   : > { %v585_v46 = vpop.permute.xlu1 %584 }
  0xa9   : > { %v611_v63 = vsel %vm609_vm10, %v596_v31, %v585_v46  ;;  %v862_v1 = vrot.slane %v860_v26, 3  ;;  %v865_v58 = vrot.slane %v863_v14, 4  ;;  %v589_v53 = vpop.permute.xlu0 %588 }
  0xaa   : > { %v853_v49 = vshrl.u32 %v611_v63, 16  ;;  %v856_v52 = vshll.u32 %v611_v63, 16  ;;  %v615_v17 = vsel %vm609_vm10, %v602_v11, %v589_v53  ;;  %v1043_v63 = vsel %vm172_vm0, %v1988_v15, %v2009_v57 }
  0xab   : > { %v868_v28 = vshrl.u32 %v615_v17, 16  ;;  %v871_v29 = vshll.u32 %v615_v17, 16  ;;  %v866_v16 = vor.u32 %v865_v58, %v862_v1  ;;  %v1041_v11 = vsel %vm172_vm0, %v1956_v21, %v2012_v59 }
  0xac   : > { %v855_v60 = vrot.slane %v853_v49, 3  ;;  %v858_v61 = vrot.slane %v856_v52, 4  ;;  %v699_v0 = vpop.permute.xlu1 %698 }
  0xad   : > { %v722_v18 = vsel %vm609_vm10, %v710_v56, %v699_v0  ;;  %v870_v27 = vrot.slane %v868_v28, 3  ;;  %v873_v10 = vrot.slane %v871_v29, 4  ;;  %v701_v35 = vpop.permute.xlu0 %700 }
  0xae   : > { %v735_v37 = vshrl.u32 %v722_v18, 16  ;;  %v859_v23 = vor.u32 %v858_v61, %v855_v60  ;;  %v738_v6 = vshll.u32 %v722_v18, 16  ;;  %v724_v8 = vsel %vm609_vm10, %v712_v3, %v701_v35 }
  0xaf   : > { %v2037_v24 = vor.u32 %v873_v10, %v870_v27  ;;  %v742_v32 = vshrl.u32 %v724_v8, 16  ;;  %v745_v34 = vshll.u32 %v724_v8, 16 }
  0xb0   : > { %v737_v54 = vrot.slane %v735_v37, 7  ;;  %v705_v9 = vpop.permute.xlu1 %704  ;;  %v867_v7 = vsel %vm473_vm15, %v859_v23, %v866_v16 }
  0xb1   : > { %v728_v30 = vsel %vm609_vm10, %v718_v2, %v705_v9  ;;  %1416 = vmatprep.mubr.msk.bf16.mxu0 %vm768_vm11, %v867_v7  ;;  %v744_v39 = vrot.slane %v742_v32, 7  ;;  %v703_v31 = vpop.permute.xlu0 %702  ;;  %v875_v44 = vsel %vm473_vm15, %v866_v16, %v2037_v24 }
  0xb2   : > { %v740_v13 = vor.u32 %v738_v6, %v737_v54  ;;  %v756_v42 = vshrl.u32 %v728_v30, 16  ;;  %v759_v62 = vshll.u32 %v728_v30, 16  ;;  %v726_v45 = vsel %vm609_vm10, %v715_v36, %v703_v31  ;;  %1417 = vmatmul.mubr.msk.bf16.vlgmr.msra.gmra.mrb[0].mxu0 %vm768_vm11, %v875_v44 }
  0xb3   : > { %v747_v46 = vor.u32 %v745_v34, %v744_v39  ;;  %v749_v47 = vshrl.u32 %v726_v45, 16  ;;  %1425 = vmatpush3.bf16.msra.mxu0 %v1971_v22  ;;  %v752_v49 = vshll.u32 %v726_v45, 16 }
  0xb4   : > { %v758_v40 = vrot.slane %v756_v42, 7  ;;  %v1028_v41 = vpop.permute.xlu1 %1027  ;;  %v741_v50 = vsel %vm646_vm8, %v734_v25, %v740_v13 }
  0xb5   : > { %1406 = vmatprep.mubr.msk.bf16.mxu1 %vm768_vm11, %v741_v50  ;;  %v751_v14 = vrot.slane %v749_v47, 7  ;;  %v1008_v52 = vpop.permute.xlu0 %1007  ;;  %v748_v55 = vsel %vm646_vm8, %v737_v54, %v747_v46 }
  0xb6   : > { %v761_v12 = vor.u32 %v759_v62, %v758_v40  ;;  %v1039_v1 = vsel %vm172_vm0, %v979_v48, %v1008_v52  ;;  %1407 = vmatmul.mubr.msk.bf16.vlgmr.msra.gmra.mrb[0].mxu1 %vm768_vm11, %v748_v55 }
  0xb7   : > { %v754_v60 = vor.u32 %v752_v49, %v751_v14  ;;  %v1051_v22 = vsel %vm609_vm10, %v1039_v1, %v1028_v41  ;;  %1435 = vmatpush3.bf16.msra.mxu1 %v1958_v5 }
  0xb8   : > { %v1032_v26 = vpop.permute.xlu1 %1031  ;;  %v762_v61 = vsel %vm646_vm8, %v751_v14, %v761_v12  ;;  %v1063_v15 = vshrl.u32 %v1051_v22, 16  ;;  %v1066_v57 = vshll.u32 %v1051_v22, 16 }
  0xb9   : > { %v1055_v56 = vsel %vm609_vm10, %v1043_v63, %v1032_v26  ;;  %v1030_v19 = vpop.permute.xlu0 %1029  ;;  %v755_v17 = vsel %vm646_vm8, %v744_v39, %v754_v60 }
  0xba   : > { %v1078_v51 = vshrl.u32 %v1055_v56, 16  ;;  %v1081_v58 = vshll.u32 %v1055_v56, 16  ;;  %v1053_v37 = vsel %vm609_vm10, %v1041_v11, %v1030_v19  ;;  %1410 = vmatprep.mubr.msk.bf16.mxu1 %vm768_vm11, %v755_v17  ;;  %v1065_v23 = vrot.slane %v1063_v15, 3  ;;  %v1365_v15 = vld [vmem:[%s2171_s2] ss:$0 sm:$0xff] }
  0xbb   : > { %v1068_v28 = vrot.slane %v1066_v57, 4  ;;  %v1070_v29 = vshrl.u32 %v1053_v37, 16  ;;  %v1073_v5 = vshll.u32 %v1053_v37, 16 }
  0xbc   : > { %v1010_v0 = vpop.permute.xlu1 %1009  ;;  %v1080_v53 = vrot.slane %v1078_v51, 3  ;;  %v1083_v18 = vrot.slane %v1081_v58, 4 }
  0xbd   : > { %v1072_v3 = vrot.slane %v1070_v29, 3  ;;  %v1075_v54 = vrot.slane %v1073_v5, 4  ;;  %v566_v6 = vpop.permute.xlu0 %565  ;;  %v1069_v59 = vor.u32 %v1068_v28, %v1065_v23  ;;  %v1046_v10 = vsel %vm172_vm0, %v1994_v33, %v1010_v0 }
  0xbe   : > { %v1084_v2 = vor.u32 %v1083_v18, %v1080_v53  ;;  %v605_v21 = vsel %vm172_vm0, %v1997_v38, %v566_v6  ;;  %1411 = vmatmul.mubr.msk.bf16.gmra.mrb[4].mxu1 %vm768_vm11, %v762_v61 }
  0xbf   : > { %v1076_v9 = vor.u32 %v1075_v54, %v1072_v3 }
  0xc0   : > { %v591_v16 = vpop.permute.xlu1 %590 }
  0xc1   : > { %v617_v27 = vsel %vm609_vm10, %v605_v21, %v591_v16  ;;  %v568_v25 = vpop.permute.xlu0 %567  ;;  %v1077_v13 = vsel %vm473_vm15, %v1069_v59, %v1076_v9  ;;  %v1085_v8 = vsel %vm473_vm15, %v1076_v9, %v1084_v2 }
  0xc2   : > { %v876_v35 = vshrl.u32 %v617_v27, 16  ;;  %v879_v30 = vshll.u32 %v617_v27, 16  ;;  %1426 = vmatprep.mubr.msk.bf16.mxu0 %vm768_vm11, %v1077_v13  ;;  %v608_v12 = vsel %vm172_vm0, %v2000_v20, %v568_v25 }
  0xc3   : > { %1427 = vmatmul.mubr.msk.bf16.vlgmr.msra.gmra.mrb[0].mxu0 %vm768_vm11, %v1085_v8 }
  0xc4   : > { %v1034_v7 = vpop.permute.xlu1 %1033  ;;  %v878_v38 = vrot.slane %v876_v35, 3  ;;  %v881_v32 = vrot.slane %v879_v30, 4 }
  0xc5   : > { %v1057_v42 = vsel %vm609_vm10, %v1046_v10, %v1034_v7  ;;  %v1012_v39 = vpop.permute.xlu0 %1011 }
  0xc6   : > { %v1086_v36 = vshrl.u32 %v1057_v42, 16  ;;  %v1089_v40 = vshll.u32 %v1057_v42, 16  ;;  %v882_v41 = vor.u32 %v881_v32, %v878_v38  ;;  %v1049_v34 = vsel %vm172_vm0, %v2003_v4, %v1012_v39 }
  0xc7   : > { %vm1242_vm0 = vcmask 519168  }
  0xc8   : > { %v1088_v33 = vrot.slane %v1086_v36, 3  ;;  %v1036_v43 = vpop.permute.xlu1 %1035  ;;  %v1091_v50 = vrot.slane %v1089_v40, 4  ;;  %v883_v62 = vsel %vm473_vm15, %v2037_v24, %v882_v41 }
  0xc9   : > { %v1059_v44 = vsel %vm609_vm10, %v1049_v34, %v1036_v43  ;;  %1420 = vmatprep.mubr.msk.bf16.mxu1 %vm768_vm11, %v883_v62  ;;  %v593_v47 = vpop.permute.xlu0 %592 }
  0xca   : > { %v1092_v31 = vor.u32 %v1091_v50, %v1088_v33  ;;  %v1094_v45 = vshrl.u32 %v1059_v44, 16  ;;  %v1097_v46 = vshll.u32 %v1059_v44, 16  ;;  %v619_v4 = vsel %vm609_vm10, %v608_v12, %v593_v47 }
  0xcb   : > { %v884_v24 = vshrl.u32 %v619_v4, 16  ;;  %v887_v14 = vshll.u32 %v619_v4, 16 }
  0xcc   : > { %v1093_v48 = vsel %vm473_vm15, %v1084_v2, %v1092_v31  ;;  %v1096_v63 = vrot.slane %v1094_v45, 3  ;;  %v1099_v26 = vrot.slane %v1097_v46, 4 }
  0xcd   : > { %1430 = vmatprep.mubr.msk.bf16.mxu0 %vm768_vm11, %v1093_v48  ;;  %v886_v52 = vrot.slane %v884_v24, 3  ;;  %v889_v55 = vrot.slane %v887_v14, 4 }
  0xce   : > { %v1100_v49 = vor.u32 %v1099_v26, %v1096_v63 }
  0xcf   : > { %v890_v1 = vor.u32 %v889_v55, %v886_v52 }
  0xd0   : > { %v1101_v56 = vsel %vm473_vm15, %v1092_v31, %v1100_v49 }
  0xd1   : > { %1431 = vmatmul.mubr.msk.bf16.gmra.mrb[4].mxu0 %vm768_vm11, %v1101_v56  ;;  %v891_v20 = vsel %vm473_vm15, %v882_v41, %v890_v1 }
  0xd2   : > { %1421 = vmatmul.mubr.msk.bf16.vlgmr.msra.gmra.mrb[4].mxu1 %vm768_vm11, %v891_v20 }
 0x189   : > { %v1408_v51 = vpop.f32.mrb[0].mxu1 }
 0x18a   : > { %v822_v58 = vpop.f32.mrb[1].mxu1 }
 0x18b   : > { %v1409_v60 = vpop.f32.mrb[2].mxu1 }
 0x18c   : > { %v825_v22 = vpop.f32.mrb[3].mxu1 }
 0x196   : > { %v1428_v61 = vpop.f32.mrb[0].mxu0 }
 0x197   : > { %v1436_v57 = vadd.f32 %v1428_v61, %v1408_v51  ;;  %v1156_v0 = vpop.f32.mrb[1].mxu0 }
 0x198   : > { %v1437_v11 = vadd.f32 %v1156_v0, %v822_v58  ;;  %v1429_v53 = vpop.f32.mrb[2].mxu0 }
 0x199   : > { %v1204_v18 = vadd.f32 %v1436_v57, %v1365_v15  ;;  %v1438_v19 = vadd.f32 %v1429_v53, %v1409_v60  ;;  %v1159_v17 = vpop.f32.mrb[3].mxu0 }
 0x19a   : > { %v1202_v37 = vadd.f32 %v1437_v11, %v1365_v15  ;;  %v1439_v23 = vadd.f32 %v1159_v17, %v825_v22 }
 0x19b   : > { %v1382_v28 = vpack.c.bf16 %v1204_v18, %v1204_v18  ;;  %v1205_v29 = vadd.f32 %v1438_v19, %v1365_v15 }
 0x19c   : > { %v1380_v5 = vpack.c.bf16 %v1202_v37, %v1202_v37  ;;  %v1203_v16 = vadd.f32 %v1439_v23, %v1365_v15 }
 0x19d   : > { %1245 = vst.msk [vmem:[%s2099_s20 + $0x8] sm:$0xf] %vm1242_vm0, %v1382_v28  ;;  %v1383_v2 = vpack.c.bf16 %v1205_v29, %v1205_v29 }
 0x19e   : > { %1243 = vst.msk [vmem:[%s2099_s20] sm:$0xf] %vm1242_vm0, %v1380_v5  ;;  %v1381_v3 = vpack.c.bf16 %v1203_v16, %v1203_v16 }
 0x19f   : > { %1246 = vst.msk [vmem:[%s2099_s20 + $0xc] sm:$0xf] %vm1242_vm0, %v1383_v2 }
 0x1a0   : > { %1244 = vst.msk [vmem:[%s2099_s20 + $0x4] sm:$0xf] %vm1242_vm0, %v1381_v3 }
 0x1a4   : > { %v1432_v54 = vpop.f32.mrb[4].mxu0 }
 0x1a5   : > { %v1172_v6 = vpop.f32.mrb[5].mxu0  ;;  %v1422_v59 = vpop.f32.mrb[4].mxu1 }
 0x1a6   : > { %v1433_v21 = vpop.f32.mrb[6].mxu0  ;;  %v1440_v27 = vadd.f32 %v1432_v54, %v1422_v59  ;;  %v962_v10 = vpop.f32.mrb[5].mxu1 }
 0x1a7   : > { %v1175_v9 = vpop.f32.mrb[7].mxu0  ;;  %v1441_v35 = vadd.f32 %v1172_v6, %v962_v10  ;;  %v1423_v30 = vpop.f32.mrb[6].mxu1 }
 0x1a8   : > { %v1208_v7 = vadd.f32 %v1440_v27, %v1365_v15  ;;  %v1442_v25 = vadd.f32 %v1433_v21, %v1423_v30  ;;  %v965_v13 = vpop.f32.mrb[7].mxu1 }
 0x1a9   : > { %v1206_v8 = vadd.f32 %v1441_v35, %v1365_v15  ;;  %v1443_v42 = vadd.f32 %v1175_v9, %v965_v13 }
 0x1aa   : > { %v1386_v38 = vpack.c.bf16 %v1208_v7, %v1208_v7  ;;  %v1209_v32 = vadd.f32 %v1442_v25, %v1365_v15 }
 0x1ab   : > { %v1384_v36 = vpack.c.bf16 %v1206_v8, %v1206_v8  ;;  %v1207_v40 = vadd.f32 %v1443_v42, %v1365_v15 }
 0x1ac   : > { %1249 = vst.msk [vmem:[%s2099_s20 + $0x18] sm:$0xf] %vm1242_vm0, %v1386_v38  ;;  %v1387_v41 = vpack.c.bf16 %v1209_v32, %v1209_v32 }
 0x1ad   : > { %1247 = vst.msk [vmem:[%s2099_s20 + $0x10] sm:$0xf] %vm1242_vm0, %v1384_v36  ;;  %v1385_v33 = vpack.c.bf16 %v1207_v40, %v1207_v40 }
 0x1ae   : > { %1250 = vst.msk [vmem:[%s2099_s20 + $0x1c] sm:$0xf] %vm1242_vm0, %v1387_v41 }
 0x1af   : > { %1248 = vst.msk [vmem:[%s2099_s20 + $0x14] sm:$0xf] %vm1242_vm0, %v1385_v33 }
 0x1b0   : > { %1517 = shalt.err (!%p1514_p3)
}
 0x1b1   : > { %s1518_s6 = scalar_lea.hbm %s2116_s28, 512  ;;  %s1522_s9 = scalar_lea.hbm %s2172_s3, 1024 }
 0x1b2   : > { %p1519_p4 = scmp.ne.s32.totalorder %s2116_s28, %s1518_s6  ;;  %p1523_p9 = scmp.lt.u32.totalorder %s2116_s28, %s2172_s3 }
 0x1b3   : > { %p1524_p10 = scmp.lt.u32.totalorder %s1522_s9, %s1518_s6  ;;  %p1526_p12 = scmp.lt.u32.totalorder %s1518_s6, %s2116_s28 }
 0x1b4   : > { %p1520_p7 = pnand %p1519_p4, %p1633_p5 }
 0x1b5   : > { %p1525_p11 = por %p1524_p10, %p1523_p9 }
 0x1b6   : > { %p1521_p8 = pneg %p1520_p7 }
 0x1b7   : > { %p1527_p13 = por %p1526_p12, %p1525_p11 }
 0x1b9   : > { %p1528_p0 = pnand %p1527_p13, %p1521_p8 }
 0x1bb   : > { %1531 = shalt.err (!%p1528_p0)
}
 0x1bc   : > { %s1573_s17 = smov 64   ;;  %s1574_s19 = smov 4  }
 0x1bd   : > { %1452 = dma.vmem_to_hbm [thread:$0]  (%p1633_p5), %s2118_s25, 512, %s2116_s28, %s2128_s16, %s1573_s17, %s1573_s17, %s1574_s19  }
 0x1be PF: > { %p1458_p1 = scmp.ge.s32.totalorder %s1566_s15, 2  ;;  %s1280_s20 = sand.u32 1, %s1554_s12  }
 0x1bf   : > { %s1281_s24 = scalar_lea.sflag [#allocation4], %s1280_s20 }
 0x1c0   : > { %p1455_p2 = pnand %p1458_p1, %p1637_p6 }
 0x1c2   : > { %1549 = dma.done.wait (!%p1455_p2), %s1281_s24, 512  }
 0x1c3   : > { %1551 = vsyncadd (!%p1455_p2), %s1281_s24, 4294966784  ;;  %p13_p3 = scmp.ge.s32.totalorder %s1620_s18, 4   ;;  %s2189_s12 = smov %s1558_s13 }
 0x1c4   : > { %s2190_s13 = smov %s1562_s14  ;;  %s2191_s14 = smov %s1631_s21 }
 0x1c5   : > { %s2192_s15 = smov %s1620_s18  ;;  %15 = sbr.rel (!%p13_p3) target bundleno = 3 (0x3), region = 69 }
 0x1cc   :  { %1286 = vsyncpa [#allocation4], 1 }
 0x1cd   :  { %1288 = vsyncpa [#allocation4 + $0x1], 1 }

</bundles_post_ra>
